<compile_context>
chip_gen: v6e
topology: v6e:2x2x1
jax: 0.10.0
libtpu: 0.0.40
codegen_flags: <defaults>
</compile_context>

<pallas_src>
import jax
import jax.numpy as jnp
from jax.experimental import pallas as pl
from jax.experimental.pallas import tpu as pltpu


def _round_up(x: int, m: int) -> int:
    return ((x + m - 1) // m) * m


def _pad_to(a, shape):
    pads = [(0, s - d) for d, s in zip(a.shape, shape)]
    return jnp.pad(a, pads)


def critic_kernel(x_ref, w_sh_ref, b_sh_ref, w1_ref, b1_ref, w2_ref, b2_ref, o_ref):
    # --- shared_layers (synthetic trunk): Linear(state_dim -> input_shape) + ReLU ---
    h = jnp.dot(x_ref[...], w_sh_ref[...],
                preferred_element_type=jnp.float32) + b_sh_ref[...]
    h = jnp.maximum(h, 0.0).astype(w1_ref.dtype)          # back to bf16 for the MXU

    # --- critic_head: Linear -> ReLU -> Linear(hidden -> 1 [padded to 128 lanes]) ---
    h1 = jnp.dot(h, w1_ref[...],
                 preferred_element_type=jnp.float32) + b1_ref[...]
    h1 = jnp.maximum(h1, 0.0).astype(w2_ref.dtype)

    v = jnp.dot(h1, w2_ref[...],
                preferred_element_type=jnp.float32) + b2_ref[...]
    o_ref[...] = v.astype(o_ref.dtype)


def critic_forward(state, params, *, block_b=512):
    """state: [B, state_dim] f32; params: dict of [in, out] weights and [1, out] biases."""
    B, d_state = state.shape
    d_in = params["w_sh"].shape[1]      # input_shape
    d_hid = params["w1"].shape[1]       # hidden_size
    d_out = params["w2"].shape[1]       # 1 (value head)

    LANE = 128
    d_state_p = _round_up(d_state, LANE)
    d_in_p = _round_up(d_in, LANE)
    d_hid_p = _round_up(d_hid, LANE)
    d_out_p = _round_up(d_out, LANE)

    # Batch tile: big enough to pipeline at large B, no bigger than the (padded) batch.
    tb = min(block_b, _round_up(B, 8))
    b_p = _round_up(B, tb)

    # Zero-pad to lane-dense shapes; bf16 for MXU operands, f32 for biases.
    x_p = _pad_to(state, (b_p, d_state_p)).astype(jnp.bfloat16)
    w_sh = _pad_to(params["w_sh"], (d_state_p, d_in_p)).astype(jnp.bfloat16)
    b_sh = _pad_to(params["b_sh"], (1, d_in_p)).astype(jnp.float32)
    w1 = _pad_to(params["w1"], (d_in_p, d_hid_p)).astype(jnp.bfloat16)
    b1 = _pad_to(params["b1"], (1, d_hid_p)).astype(jnp.float32)
    w2 = _pad_to(params["w2"], (d_hid_p, d_out_p)).astype(jnp.bfloat16)
    b2 = _pad_to(params["b2"], (1, d_out_p)).astype(jnp.float32)

    grid = (pl.cdiv(b_p, tb),)

    def batch_spec(shape):
        return pl.BlockSpec(shape, lambda i: (i, 0))

    def resident_spec(shape):
        return pl.BlockSpec(shape, lambda i: (0, 0))

    out = pl.pallas_call(
        critic_kernel,
        out_shape=jax.ShapeDtypeStruct((b_p, d_out_p), jnp.float32),
        grid=grid,
        in_specs=[
            batch_spec((tb, d_state_p)),           # state tile  (per grid step)
            resident_spec((d_state_p, d_in_p)),    # w_sh        (VMEM-resident)
            resident_spec((1, d_in_p)),            # b_sh
            resident_spec((d_in_p, d_hid_p)),      # w1
            resident_spec((1, d_hid_p)),           # b1
            resident_spec((d_hid_p, d_out_p)),     # w2
            resident_spec((1, d_out_p)),           # b2
        ],
        out_specs=batch_spec((tb, d_out_p)),
        compiler_params=pltpu.CompilerParams(
            dimension_semantics=("parallel",)),
    )(x_p, w_sh, b_sh, w1, b1, w2, b2)

    return out[:B, :d_out]


def critic_reference(state, p, cast_bf16=True):
    """Pure-JAX reference.  cast_bf16=True mirrors the kernel's bf16 MXU operands."""
    c = (lambda a: a.astype(jnp.bfloat16)) if cast_bf16 else (lambda a: a)
    h = jnp.dot(c(state), c(p["w_sh"]), preferred_element_type=jnp.float32) + p["b_sh"]
    h = jnp.maximum(h, 0.0)
    h1 = jnp.dot(c(h), c(p["w1"]), preferred_element_type=jnp.float32) + p["b1"]
    h1 = jnp.maximum(h1, 0.0)
    v = jnp.dot(c(h1), c(p["w2"]), preferred_element_type=jnp.float32) + p["b2"]
    return v


if __name__ == "__main__":
    # Shapes consistent with the module's constructor:
    #   shared_layers: state_dim -> input_shape   (synthetic Linear+ReLU trunk)
    #   critic_head:   input_shape -> hidden_size -> 1
    # TODO(synk): `shared_layers` is an arbitrary nn.Module in the spec; modeled here
    #             as a single Linear+ReLU trunk.
    state_dim = 16
    input_shape = 32
    hidden_size = 32

    key = jax.random.PRNGKey(0)
    ks = jax.random.split(key, 8)

    params = {
        "w_sh": 0.1 * jax.random.normal(ks[0], (state_dim, input_shape), jnp.float32),
        "b_sh": 0.1 * jax.random.normal(ks[1], (1, input_shape), jnp.float32),
        "w1":   0.1 * jax.random.normal(ks[2], (input_shape, hidden_size), jnp.float32),
        "b1":   0.1 * jax.random.normal(ks[3], (1, hidden_size), jnp.float32),
        "w2":   0.1 * jax.random.normal(ks[4], (hidden_size, 1), jnp.float32),
        "b2":   0.1 * jax.random.normal(ks[5], (1, 1), jnp.float32),
    }

    # Case 1: small batch (toy spec shapes).
    state_small = jax.random.normal(ks[6], (8, state_dim), jnp.float32)
    out_small = jax.block_until_ready(critic_forward(state_small, params))
    assert out_small.shape == (8, 1)
    ref_small = critic_reference(state_small, params)
    assert jnp.allclose(out_small, ref_small, atol=1e-4, rtol=1e-4), "mismatch (small batch)"
    assert jnp.allclose(out_small, critic_reference(state_small, params, cast_bf16=False),
                        atol=2e-2), "mismatch vs f32 reference (small batch)"

    # Case 2: larger, non-multiple batch to exercise the batch grid + padding path.
    state_big = jax.random.normal(ks[7], (1040, state_dim), jnp.float32)
    out_big = jax.block_until_ready(critic_forward(state_big, params))
    assert out_big.shape == (1040, 1)
    ref_big = critic_reference(state_big, params)
    assert jnp.allclose(out_big, ref_big, atol=1e-4, rtol=1e-4), "mismatch (large batch)"

    print("KERNEL_OK")
</pallas_src>

<mosaic_0001>
module attributes {stable_mosaic.version = 11 : i64} {
  func.func @critic_kernel(%arg0: i32, %arg1: memref<8x128xbf16, #tpu.memory_space<vmem>>, %arg2: memref<128x128xbf16, #tpu.memory_space<vmem>>, %arg3: memref<1x128xf32, #tpu.memory_space<vmem>>, %arg4: memref<128x128xbf16, #tpu.memory_space<vmem>>, %arg5: memref<1x128xf32, #tpu.memory_space<vmem>>, %arg6: memref<128x128xbf16, #tpu.memory_space<vmem>>, %arg7: memref<1x128xf32, #tpu.memory_space<vmem>>, %arg8: memref<8x128xf32, #tpu.memory_space<vmem>>) attributes {dimension_semantics = [#tpu.dimension_semantics<parallel>], iteration_bounds = array<i64: 1>, scalar_prefetch = 0 : i64, scratch_operands = 0 : i64, tpu.core_type = #tpu.core_type<tc>, window_params = [{transform_indices = @transform_0, window_bounds = array<i64: 8, 128>}, {pipeline_mode = #tpu.pipeline_mode<synchronous>, transform_indices = @transform_1, window_bounds = array<i64: 128, 128>}, {pipeline_mode = #tpu.pipeline_mode<synchronous>, transform_indices = @transform_2, window_bounds = array<i64: 1, 128>}, {pipeline_mode = #tpu.pipeline_mode<synchronous>, transform_indices = @transform_3, window_bounds = array<i64: 128, 128>}, {pipeline_mode = #tpu.pipeline_mode<synchronous>, transform_indices = @transform_4, window_bounds = array<i64: 1, 128>}, {pipeline_mode = #tpu.pipeline_mode<synchronous>, transform_indices = @transform_5, window_bounds = array<i64: 128, 128>}, {pipeline_mode = #tpu.pipeline_mode<synchronous>, transform_indices = @transform_6, window_bounds = array<i64: 1, 128>}, {transform_indices = @transform_7, window_bounds = array<i64: 8, 128>}]} {
    %c0 = arith.constant 0 : index
    %c0_0 = arith.constant 0 : index
    %0 = vector.load %arg1[%c0, %c0_0] : memref<8x128xbf16, #tpu.memory_space<vmem>>, vector<8x128xbf16>
    %c0_1 = arith.constant 0 : index
    %c0_2 = arith.constant 0 : index
    %1 = vector.load %arg2[%c0_1, %c0_2] : memref<128x128xbf16, #tpu.memory_space<vmem>>, vector<128x128xbf16>
    %cst = arith.constant dense<0.000000e+00> : vector<8x128xf32>
    %2 = tpu.matmul %0, %1, %cst {dimension_numbers = #tpu.dot_dimension_numbers<[1], [0], [0], [1], [0, 0, 1, 1], [], []>} : vector<8x128xbf16>, vector<128x128xbf16>, vector<8x128xf32> -> vector<8x128xf32>
    %c0_3 = arith.constant 0 : index
    %c0_4 = arith.constant 0 : index
    %3 = vector.load %arg3[%c0_3, %c0_4] : memref<1x128xf32, #tpu.memory_space<vmem>>, vector<1x128xf32>
    %4 = vector.broadcast %3 : vector<1x128xf32> to vector<8x128xf32>
    %5 = arith.addf %2, %4 : vector<8x128xf32>
    %cst_5 = arith.constant 0.000000e+00 : f32
    %6 = vector.broadcast %cst_5 : f32 to vector<8x128xf32>
    %7 = arith.maximumf %5, %6 : vector<8x128xf32>
    %8 = arith.truncf %7 : vector<8x128xf32> to vector<8x128xbf16>
    %c0_6 = arith.constant 0 : index
    %c0_7 = arith.constant 0 : index
    %9 = vector.load %arg4[%c0_6, %c0_7] : memref<128x128xbf16, #tpu.memory_space<vmem>>, vector<128x128xbf16>
    %cst_8 = arith.constant dense<0.000000e+00> : vector<8x128xf32>
    %10 = tpu.matmul %8, %9, %cst_8 {dimension_numbers = #tpu.dot_dimension_numbers<[1], [0], [0], [1], [0, 0, 1, 1], [], []>} : vector<8x128xbf16>, vector<128x128xbf16>, vector<8x128xf32> -> vector<8x128xf32>
    %c0_9 = arith.constant 0 : index
    %c0_10 = arith.constant 0 : index
    %11 = vector.load %arg5[%c0_9, %c0_10] : memref<1x128xf32, #tpu.memory_space<vmem>>, vector<1x128xf32>
    %12 = vector.broadcast %11 : vector<1x128xf32> to vector<8x128xf32>
    %13 = arith.addf %10, %12 : vector<8x128xf32>
    %cst_11 = arith.constant 0.000000e+00 : f32
    %14 = vector.broadcast %cst_11 : f32 to vector<8x128xf32>
    %15 = arith.maximumf %13, %14 : vector<8x128xf32>
    %16 = arith.truncf %15 : vector<8x128xf32> to vector<8x128xbf16>
    %c0_12 = arith.constant 0 : index
    %c0_13 = arith.constant 0 : index
    %17 = vector.load %arg6[%c0_12, %c0_13] : memref<128x128xbf16, #tpu.memory_space<vmem>>, vector<128x128xbf16>
    %cst_14 = arith.constant dense<0.000000e+00> : vector<8x128xf32>
    %18 = tpu.matmul %16, %17, %cst_14 {dimension_numbers = #tpu.dot_dimension_numbers<[1], [0], [0], [1], [0, 0, 1, 1], [], []>} : vector<8x128xbf16>, vector<128x128xbf16>, vector<8x128xf32> -> vector<8x128xf32>
    %c0_15 = arith.constant 0 : index
    %c0_16 = arith.constant 0 : index
    %19 = vector.load %arg7[%c0_15, %c0_16] : memref<1x128xf32, #tpu.memory_space<vmem>>, vector<1x128xf32>
    %20 = vector.broadcast %19 : vector<1x128xf32> to vector<8x128xf32>
    %21 = arith.addf %18, %20 : vector<8x128xf32>
    %c0_17 = arith.constant 0 : index
    %c0_18 = arith.constant 0 : index
    %22 = vector.load %arg8[%c0_17, %c0_18] : memref<8x128xf32, #tpu.memory_space<vmem>>, vector<8x128xf32>
    tpu.vector_store %arg8[%c0_17, %c0_18], %21 {strides = array<i32>} : memref<8x128xf32, #tpu.memory_space<vmem>>, vector<8x128xf32>,
    return
  }
  func.func @transform_0(%arg0: i32) -> (i32, i32) {
    %c0_i32 = arith.constant 0 : i32
    %c0_i32_0 = arith.constant 0 : i32
    return %arg0, %c0_i32 : i32, i32
  }
  func.func @transform_1(%arg0: i32) -> (i32, i32) {
    %c0_i32 = arith.constant 0 : i32
    %c0_i32_0 = arith.constant 0 : i32
    %c0_i32_1 = arith.constant 0 : i32
    return %c0_i32, %c0_i32_0 : i32, i32
  }
  func.func @transform_2(%arg0: i32) -> (i32, i32) {
    %c0_i32 = arith.constant 0 : i32
    %c0_i32_0 = arith.constant 0 : i32
    %c0_i32_1 = arith.constant 0 : i32
    return %c0_i32, %c0_i32_0 : i32, i32
  }
  func.func @transform_3(%arg0: i32) -> (i32, i32) {
    %c0_i32 = arith.constant 0 : i32
    %c0_i32_0 = arith.constant 0 : i32
    %c0_i32_1 = arith.constant 0 : i32
    return %c0_i32, %c0_i32_0 : i32, i32
  }
  func.func @transform_4(%arg0: i32) -> (i32, i32) {
    %c0_i32 = arith.constant 0 : i32
    %c0_i32_0 = arith.constant 0 : i32
    %c0_i32_1 = arith.constant 0 : i32
    return %c0_i32, %c0_i32_0 : i32, i32
  }
  func.func @transform_5(%arg0: i32) -> (i32, i32) {
    %c0_i32 = arith.constant 0 : i32
    %c0_i32_0 = arith.constant 0 : i32
    %c0_i32_1 = arith.constant 0 : i32
    return %c0_i32, %c0_i32_0 : i32, i32
  }
  func.func @transform_6(%arg0: i32) -> (i32, i32) {
    %c0_i32 = arith.constant 0 : i32
    %c0_i32_0 = arith.constant 0 : i32
    %c0_i32_1 = arith.constant 0 : i32
    return %c0_i32, %c0_i32_0 : i32, i32
  }
  func.func @transform_7(%arg0: i32) -> (i32, i32) {
    %c0_i32 = arith.constant 0 : i32
    %c0_i32_0 = arith.constant 0 : i32
    return %arg0, %c0_i32 : i32, i32
  }
}

</mosaic_0001>

<bundles_post_ra>
// kernel: tpu_custom_call.1
= control target key start
LH: loop header
LB: loop body
LE: loop exit
PB: predicated region body
PF: predicated region fallthrough
CT: control target
= control target key end

     0   :  { %12 = vsyncpa [#allocation3], 0  ;;  %s804_s0 = inlined_call_operand.hbm [shape: bf16[8,128], index: 0, kind: input, shape index: {}]   ;;  %s805_s1 = inlined_call_operand.hbm [shape: bf16[128,128], index: 1, kind: input, shape index: {}]   ;;  %s806_s2 = inlined_call_operand.vmem [shape: f32[1,128], index: 2, kind: input, shape index: {}]   ;;  %s807_s3 = inlined_call_operand.hbm [shape: bf16[128,128], index: 3, kind: input, shape index: {}]   ;;  %s808_s4 = inlined_call_operand.vmem [shape: f32[1,128], index: 4, kind: input, shape index: {}]   ;;  %s809_s5 = inlined_call_operand.hbm [shape: bf16[128,128], index: 5, kind: input, shape index: {}]   ;;  %s810_s6 = inlined_call_operand.vmem [shape: f32[1,128], index: 6, kind: input, shape index: {}]   ;;  %s811_s7 = inlined_call_operand.hbm [shape: f32[8,128], index: 7, kind: output, shape index: {}]  }
   0x1   :  { %13 = vsyncpa [#allocation6], 0 }
   0x2   :  { %14 = vsyncpa [#allocation9], 0 }
   0x3   :  { %15 = vsyncpa [#allocation4], 0  ;;  %s692_s24 = smov [#allocation5]  }
   0x4   :  { %s31_s25 = sshll.u32 %s692_s24, 4  ;;  %s32_s25 = int_to_ptr.vmem [resolvable:$true] %s31_s25 }
   0x5   :  { %s592_s26 = scalar_lea.vmem %s32_s25, 1024  ;;  %p597_p1 = scmp.lt.s32.totalorder %s32_s25, %s32_s25 }
   0x6   :  { %p593_p0 = scmp.ne.s32.totalorder %s32_s25, %s592_s26  ;;  %p598_p2 = scmp.lt.s32.totalorder %s592_s26, %s592_s26 }
   0x8   :  { %p599_p3 = por %p598_p2, %p597_p1 }
   0xa   :  { %p600_p4 = pnand %p599_p3, %p593_p0 }
   0xc   :  { %603 = shalt.err (!%p600_p4)
}
   0xd   :  { %s693_s27 = smov 64   ;;  %s694_s28 = smov 4  }
   0xe   :  { %37 = dma.hbm_to_vmem [thread:$0]  %s805_s1, 1024, %s32_s25, [#allocation6], %s693_s27, %s693_s27, %s694_s28  }
   0xf   :  { %s695_s8 = smov [#allocation2]   ;;  %s696_s10 = smov [#allocation7]  }
  0x10   :  { %s22_s9 = sshll.u32 %s695_s8, 4  ;;  %s45_s11 = sshll.u32 %s696_s10, 4  ;;  %s23_s9 = int_to_ptr.vmem [resolvable:$true] %s22_s9  ;;  %s46_s11 = int_to_ptr.vmem [resolvable:$true] %s45_s11 }
  0x11   :  { %s612_s12 = scalar_lea.vmem %s23_s9, 64  ;;  %p617_p6 = scmp.lt.s32.totalorder %s23_s9, %s23_s9 }
  0x12   :  { %p613_p5 = scmp.ne.s32.totalorder %s23_s9, %s612_s12  ;;  %p618_p7 = scmp.lt.s32.totalorder %s612_s12, %s612_s12 }
  0x14   :  { %p619_p8 = por %p618_p7, %p617_p6 }
  0x16   :  { %p620_p9 = pnand %p619_p8, %p613_p5 }
  0x18   :  { %623 = shalt.err (!%p620_p9)
}
  0x19   :  { %25 = dma.hbm_to_vmem [thread:$0]  %s804_s0, 64, %s23_s9, [#allocation3]  }
  0x1a   :  { %s632_s15 = scalar_lea.vmem %s46_s11, 1024  ;;  %p637_p11 = scmp.lt.s32.totalorder %s46_s11, %s46_s11 }
  0x1b   :  { %p633_p10 = scmp.ne.s32.totalorder %s46_s11, %s632_s15  ;;  %p638_p12 = scmp.lt.s32.totalorder %s632_s15, %s632_s15 }
  0x1d   :  { %p639_p13 = por %p638_p12, %p637_p11 }
  0x1f   :  { %p640_p0 = pnand %p639_p13, %p633_p10 }
  0x21   :  { %643 = shalt.err (!%p640_p0)
}
  0x22   :  { %51 = dma.hbm_to_vmem [thread:$0]  %s807_s3, 1024, %s46_s11, [#allocation6], %s693_s27, %s693_s27, %s694_s28  }
  0x23   :  { %s697_s17 = smov [#allocation8]  }
  0x24   :  { %s59_s18 = sshll.u32 %s697_s17, 4  ;;  %s60_s18 = int_to_ptr.vmem [resolvable:$true] %s59_s18 }
  0x25   :  { %s652_s19 = scalar_lea.vmem %s60_s18, 1024  ;;  %p657_p2 = scmp.lt.s32.totalorder %s60_s18, %s60_s18 }
  0x26   :  { %p653_p1 = scmp.ne.s32.totalorder %s60_s18, %s652_s19  ;;  %p658_p3 = scmp.lt.s32.totalorder %s652_s19, %s652_s19 }
  0x28   :  { %p659_p4 = por %p658_p3, %p657_p2 }
  0x2a   :  { %p660_p5 = pnand %p659_p4, %p653_p1 }
  0x2c   :  { %663 = shalt.err (!%p660_p5)
}
  0x2d   :  { %65 = dma.hbm_to_vmem [thread:$0]  %s809_s5, 1024, %s60_s18, [#allocation9], %s693_s27, %s693_s27, %s694_s28  }
  0x2e   :  { %684 = dma.done.wait [#allocation3], 64  }
  0x2f   :  { %685 = vsyncadd [#allocation3], 4294967232 }
  0x30   :  { %686 = dma.done.wait [#allocation6], 2048  }
  0x31   :  { %687 = vsyncadd [#allocation6], 4294965248 }
  0x32   :  { %688 = dma.done.wait [#allocation9], 1024  }
  0x33   :  { %689 = vsyncadd [#allocation9], 4294966272  ;;  %v698_v0 = vmov 0.0   ;;  %vm699_vm0 = vmmov 0   ;;  %v560_v1 = vld [vmem:[#allocation5 + $0x38] sm:$0xff]   ;;  %v561_v2 = vld [vmem:[#allocation5 + $0x30] sm:$0xff]  }
  0x34   :  { %491 = vmatprep.subr.bf16.mxu0 %v698_v0  ;;  %507 = vmatprep.mubr.msk.bf16.mxu0 %vm699_vm0, %v698_v0  ;;  %v562_v3 = vld [vmem:[#allocation5 + $0x28] sm:$0xff]   ;;  %v568_v4 = vld [vmem:[#allocation7 + $0x38] sm:$0xff]   ;;  %v563_v5 = vld [vmem:[#allocation5 + $0x20] sm:$0xff]   ;;  %s700_s24 = smov [#allocation10]  }
  0x35   :  { %511 = vmatprep.subr.bf16.mxu1 %v698_v0  ;;  %527 = vmatprep.mubr.msk.bf16.mxu1 %vm699_vm0, %v698_v0  ;;  %v569_v6 = vld [vmem:[#allocation7 + $0x30] sm:$0xff]   ;;  %v564_v7 = vld [vmem:[#allocation5 + $0x18] sm:$0xff]   ;;  %v570_v8 = vld [vmem:[#allocation7 + $0x28] sm:$0xff]   ;;  %s426_s25 = sshll.u32 %s700_s24, 4  ;;  %s427_s25 = int_to_ptr.vmem [resolvable:$true] %s426_s25 }
  0x36   :  { %492 = vmatpush3.bf16.msra.mxu0 %v560_v1  ;;  %512 = vmatpush3.bf16.msra.mxu1 %v568_v4  ;;  %v565_v9 = vld [vmem:[#allocation5 + $0x10] sm:$0xff]   ;;  %v571_v10 = vld [vmem:[#allocation7 + $0x20] sm:$0xff]   ;;  %v566_v11 = vld [vmem:[#allocation5 + $0x8] sm:$0xff]   ;;  %p669_p7 = scmp.lt.s32.totalorder %s427_s25, %s427_s25 }
  0x37   :  { %493 = vmatprep.subr.bf16.mxu0 %v698_v0  ;;  %513 = vmatprep.subr.bf16.mxu1 %v698_v0  ;;  %v572_v12 = vld [vmem:[#allocation7 + $0x18] sm:$0xff]   ;;  %v567_v13 = vld [vmem:[#allocation5] sm:$0xff]   ;;  %v573_v14 = vld [vmem:[#allocation7 + $0x10] sm:$0xff]  }
  0x38   :  { %v81_v15 = vld [vmem:[#allocation2] sm:$0xf]  ;;  %v574_v16 = vld [vmem:[#allocation7 + $0x8] sm:$0xff]   ;;  %v575_v17 = vld [vmem:[#allocation7] sm:$0xff]  }
  0x39   :  { %v576_v18 = vld [vmem:[#allocation8 + $0x38] sm:$0xff]   ;;  %v577_v19 = vld [vmem:[#allocation8 + $0x30] sm:$0xff]   ;;  %v578_v20 = vld [vmem:[#allocation8 + $0x28] sm:$0xff]  }
  0x3a   :  { %494 = vmatpush3.bf16.msra.mxu0 %v561_v2  ;;  %514 = vmatpush3.bf16.msra.mxu1 %v569_v6  ;;  %v579_v21 = vld [vmem:[#allocation8 + $0x20] sm:$0xff]   ;;  %v580_v22 = vld [vmem:[#allocation8 + $0x18] sm:$0xff]   ;;  %v581_v23 = vld [vmem:[#allocation8 + $0x10] sm:$0xff]  }
  0x3b   :  { %495 = vmatprep.subr.bf16.mxu0 %v698_v0  ;;  %515 = vmatprep.subr.bf16.mxu1 %v698_v0  ;;  %v437_v24 = vld [vmem:[%s806_s2] ss:$0 sm:$0xff]  ;;  %v582_v32 = vld [vmem:[#allocation8 + $0x8] sm:$0xff]   ;;  %v583_v33 = vld [vmem:[#allocation8] sm:$0xff]  }
  0x3c   :  { %v446_v34 = vld [vmem:[%s808_s4] ss:$0 sm:$0xff]  ;;  %s664_s4 = scalar_lea.vmem %s427_s25, 128 }
  0x3d   :  { %v455_v42 = vld [vmem:[%s810_s6] ss:$0 sm:$0xff]  ;;  %p665_p6 = scmp.ne.s32.totalorder %s427_s25, %s664_s4  ;;  %p670_p8 = scmp.lt.s32.totalorder %s664_s4, %s664_s4 }
  0x3e   :  { %496 = vmatpush3.bf16.msra.mxu0 %v562_v3  ;;  %516 = vmatpush3.bf16.msra.mxu1 %v570_v8 }
  0x3f   :  { %497 = vmatprep.subr.bf16.mxu0 %v698_v0  ;;  %517 = vmatprep.subr.bf16.mxu1 %v698_v0  ;;  %p671_p9 = por %p670_p8, %p669_p7 }
  0x41   :  { %p672_p10 = pnand %p671_p9, %p665_p6 }
  0x42   :  { %498 = vmatpush3.bf16.msra.mxu0 %v563_v5  ;;  %518 = vmatpush3.bf16.msra.mxu1 %v571_v10 }
  0x43   :  { %499 = vmatprep.subr.bf16.mxu0 %v698_v0  ;;  %519 = vmatprep.subr.bf16.mxu1 %v698_v0 }
  0x46   :  { %500 = vmatpush3.bf16.msra.mxu0 %v564_v7  ;;  %520 = vmatpush3.bf16.msra.mxu1 %v572_v12 }
  0x47   :  { %501 = vmatprep.subr.bf16.mxu0 %v698_v0  ;;  %521 = vmatprep.subr.bf16.mxu1 %v698_v0 }
  0x4a   :  { %502 = vmatpush3.bf16.msra.mxu0 %v565_v9  ;;  %522 = vmatpush3.bf16.msra.mxu1 %v573_v14 }
  0x4b   :  { %503 = vmatprep.subr.bf16.mxu0 %v698_v0  ;;  %523 = vmatprep.subr.bf16.mxu1 %v698_v0 }
  0x4e   :  { %504 = vmatpush3.bf16.msra.mxu0 %v566_v11  ;;  %524 = vmatpush3.bf16.msra.mxu1 %v574_v16 }
  0x4f   :  { %505 = vmatprep.subr.bf16.mxu0 %v698_v0  ;;  %525 = vmatprep.subr.bf16.mxu1 %v698_v0 }
  0x52   :  { %506 = vmatpush3.bf16.msra.mxu0 %v567_v13  ;;  %526 = vmatpush3.bf16.msra.mxu1 %v575_v17 }
  0x53   :  { %531 = vmatprep.subr.bf16.mxu0 %v698_v0 }
  0x55   :  { %508 = vmatmul.mubr.bf16.vlgmr.msra.gmra.mxu0 %v81_v15 }
  0x56   :  { %547 = vmatprep.mubr.msk.bf16.mxu0 %vm699_vm0, %v698_v0  ;;  %532 = vmatpush3.bf16.msra.mxu0 %v576_v18 }
  0x57   :  { %533 = vmatprep.subr.bf16.mxu0 %v698_v0 }
  0x5a   :  { %534 = vmatpush3.bf16.msra.mxu0 %v577_v19 }
  0x5b   :  { %535 = vmatprep.subr.bf16.mxu0 %v698_v0 }
  0x5e   :  { %536 = vmatpush3.bf16.msra.mxu0 %v578_v20 }
  0x5f   :  { %537 = vmatprep.subr.bf16.mxu0 %v698_v0 }
  0x62   :  { %538 = vmatpush3.bf16.msra.mxu0 %v579_v21 }
  0x63   :  { %539 = vmatprep.subr.bf16.mxu0 %v698_v0 }
  0x66   :  { %540 = vmatpush3.bf16.msra.mxu0 %v580_v22 }
  0x67   :  { %541 = vmatprep.subr.bf16.mxu0 %v698_v0 }
  0x6a   :  { %542 = vmatpush3.bf16.msra.mxu0 %v581_v23 }
  0x6b   :  { %543 = vmatprep.subr.bf16.mxu0 %v698_v0 }
  0x6e   :  { %544 = vmatpush3.bf16.msra.mxu0 %v582_v32 }
  0x6f   :  { %545 = vmatprep.subr.bf16.mxu0 %v698_v0 }
  0x72   :  { %546 = vmatpush3.bf16.msra.mxu0 %v583_v33 }
 0x115   :  { %v187_v25 = vpop.f32.mrf.mxu0 }
 0x116   :  { %v188_v26 = vadd.f32 %v437_v24, %v187_v25 }
 0x117   :  { %v509_v27 = vpop.f32.mrf.mxu0 }
 0x118   :  { %v193_v28 = vmax.f32 %v188_v26, 0.0 }
 0x119   :  { %v190_v29 = vpop.f32.mrf.mxu0 }
 0x11a   :  { %v194_v30 = vpack.c.bf16 %v193_v28, %v193_v28 }
 0x11b   :  { %v510_v31 = vpop.f32.mrf.mxu0 }
 0x11c   :  { %528 = vmatmul.mubr.bf16.vlgmr.msra.gmra.mxu1 %v194_v30 }
 0x1dc   :  { %v300_v35 = vpop.f32.mrf.mxu1 }
 0x1dd   :  { %v301_v36 = vadd.f32 %v446_v34, %v300_v35 }
 0x1de   :  { %v529_v37 = vpop.f32.mrf.mxu1 }
 0x1df   :  { %v306_v38 = vmax.f32 %v301_v36, 0.0 }
 0x1e0   :  { %v303_v39 = vpop.f32.mrf.mxu1 }
 0x1e1   :  { %v307_v40 = vpack.c.bf16 %v306_v38, %v306_v38 }
 0x1e2   :  { %v530_v41 = vpop.f32.mrf.mxu1 }
 0x1e3   :  { %548 = vmatmul.mubr.bf16.vlgmr.msra.gmra.mxu0 %v307_v40 }
 0x2a3   :  { %v413_v43 = vpop.f32.mrf.mxu0 }
 0x2a4   :  { %v414_v44 = vadd.f32 %v455_v42, %v413_v43 }
 0x2a5   :  { %v549_v45 = vpop.f32.mrf.mxu0 }
 0x2a6   :  { %419 = vst [vmem:[#allocation10] sm:$0xff] %v414_v44 }
 0x2a7   :  { %v416_v46 = vpop.f32.mrf.mxu0 }
 0x2a8   :  { %675 = shalt.err (!%p672_p10)
}
 0x2a9   :  { %429 = dma.vmem_to_hbm [thread:$0]  %s427_s25, 128, %s811_s7, [#allocation4]   ;;  %v550_v47 = vpop.f32.mrf.mxu0 }
 0x2aa   :  { %690 = dma.done.wait [#allocation4], 128  }
 0x2ab   :  { %691 = vsyncadd [#allocation4], 4294967168 }
 0x2ac   :  { %433 = vsyncpa [#allocation3], 1 }
 0x2ad   :  { %434 = vsyncpa [#allocation6], 1 }
 0x2ae   :  { %435 = vsyncpa [#allocation9], 1 }
 0x2af   :  { %436 = vsyncpa [#allocation4], 1 }

</bundles_post_ra>
